<compile_context>
chip_gen: v6e
topology: v6e:2x2x1
jax: 0.10.0
libtpu: 0.0.40
codegen_flags: <defaults>
</compile_context>

<pallas_src>
import functools

import jax
import jax.numpy as jnp
from jax import lax
from jax.experimental import pallas as pl
from jax.experimental.pallas import tpu as pltpu

_EPS = 1e-24  # epsilon of the original BPR-max


def _round_up(x, m):
    return (x + m - 1) // m * m


def _bpr_max_kernel(logits_ref, *rest, tm, n_rows, n_cols, has_mask):
    """One grid step: `tm` rows x full (padded) sample axis -> per-row loss."""
    if has_mask:
        negmask_ref, out_ref = rest
    else:
        (out_ref,) = rest

    i = pl.program_id(0)
    x = logits_ref[...].astype(jnp.float32)                     # (tm, Mp)
    mp = x.shape[1]

    row_ids = lax.broadcasted_iota(jnp.int32, (tm, mp), 0) + i * tm  # global row
    col_ids = lax.broadcasted_iota(jnp.int32, (tm, mp), 1)

    # Positive score of row r = diagonal entry (column == global row r).
    diag = (row_ids == col_ids).astype(jnp.float32)
    pos = jnp.sum(x * diag, axis=1, keepdims=True)              # (tm, 1)

    # Negative-sample selection.
    if has_mask:
        neg = negmask_ref[...] != 0                             # int8 -> bool
    else:
        # Standard BPR-max layout: every real column except the row's own
        # positive is a negative; padded lane columns are excluded.
        neg = jnp.logical_and(row_ids != col_ids, col_ids < n_cols)

    # Numerically-stable sigmoid(pos - x): 1 exp (arg <= 0) + 1 reciprocal,
    # instead of the 4-transcendental two-branch logsigmoid form.
    # (pl.reciprocal(..., approx=True) could be used here if ~1e-4 relative
    #  error is acceptable; exact divide is kept for the tolerance check.)
    diff = pos - x
    t = jnp.exp(-jnp.abs(diff))                                 # in (0, 1], no overflow
    r = 1.0 / (1.0 + t)
    sig = jnp.where(diff >= 0.0, r, t * r)

    # Row-wise softmax without materializing it: fold the denominator into a
    # per-row scalar (num / den) instead of a full (tm, Mp) divide.
    m = jnp.max(x, axis=1, keepdims=True)
    e = jnp.exp(x - m)
    den = jnp.sum(e, axis=1, keepdims=True)                     # (tm, 1)
    num = jnp.sum(jnp.where(neg, e * sig, 0.0), axis=1, keepdims=True)

    row_loss = jnp.log(num / den + _EPS)                        # (tm, 1)

    # Rows past the real row count (cdiv grid -> padded last block) write 0.
    local_rows = lax.broadcasted_iota(jnp.int32, (tm, 1), 0) + i * tm
    out_ref[...] = jnp.where(local_rows < n_rows, row_loss, 0.0)


def bpr_max_loss(logits_scores, negative_mask=None, *, tm=256):
    """Pallas BPR-max forward.  Returns a float32 scalar.

    If `negative_mask is None`, the standard mask (all columns except the
    row's own diagonal positive) is derived in-kernel, eliminating the whole
    mask HBM stream.  Otherwise the mask is streamed as int8 (1 B/elt).
    Logits are streamed in their native dtype (bf16 or f32) and upcast
    in-kernel.
    """
    n, m = logits_scores.shape
    assert n <= m, "BPR-max expects the positive of row r at column r (N <= M)"

    # Lane-dense layout: pad the sample axis to a multiple of 128.  Pad logits
    # with a large negative so padded columns vanish from the softmax.
    mp = _round_up(m, 128)
    logits_p = logits_scores
    if mp != m:
        logits_p = jnp.pad(logits_scores, ((0, 0), (0, mp - m)),
                           constant_values=-1e9)

    has_mask = negative_mask is not None
    args = [logits_p]
    if has_mask:
        mask_i8 = negative_mask.astype(jnp.int8)                # 1 B/elt stream
        if mp != m:
            mask_i8 = jnp.pad(mask_i8, ((0, 0), (0, mp - m)))   # pads aren't negatives
        args.append(mask_i8)

    # Row tile: large tiles amortize the ~0.35us/grid-step overhead; multiple
    # of 32 so the int8 mask block is sublane-tile aligned; capped so the
    # double-buffered input blocks stay well under the default scoped-VMEM
    # limit (32 MiB on v5e/v6e/v7x; v7x only has 64 MiB physical VMEM).
    bytes_per_row = mp * (logits_p.dtype.itemsize + (1 if has_mask else 0))
    vmem_budget = 24 * 1024 * 1024
    tm_vmem_cap = max(32, (vmem_budget // (2 * bytes_per_row)) // 32 * 32)
    tm = max(32, min(tm, _round_up(n, 32), tm_vmem_cap))

    n_blocks = pl.cdiv(n, tm)
    kernel = functools.partial(_bpr_max_kernel, tm=tm, n_rows=n, n_cols=m,
                               has_mask=has_mask)

    in_specs = [pl.BlockSpec((tm, mp), lambda i: (i, 0))]
    if has_mask:
        in_specs.append(pl.BlockSpec((tm, mp), lambda i: (i, 0)))

    # Per-row partial results (zero for padded rows) instead of a serialized
    # SMEM scalar accumulator: keeps the grid axis fully "parallel"
    # (megacore-shardable on v7x).  Tiny final reduction done in plain JAX.
    row_loss = pl.pallas_call(
        kernel,
        out_shape=jax.ShapeDtypeStruct((n_blocks * tm, 1), jnp.float32),
        grid_spec=pltpu.PrefetchScalarGridSpec(
            num_scalar_prefetch=0,
            grid=(n_blocks,),
            in_specs=in_specs,
            out_specs=pl.BlockSpec((tm, 1), lambda i: (i, 0)),
        ),
        compiler_params=pltpu.CompilerParams(
            dimension_semantics=("parallel",)),
    )(*args)

    return -jnp.sum(row_loss) / jnp.float32(n)


def _bpr_max_ref(logits_scores, negative_mask):
    """Pure-JAX reference: BPR-max with sigmoid-inside-log + 1e-24 epsilon."""
    positives = jnp.diag(logits_scores)[:, None]
    sig = jax.nn.sigmoid(positives - logits_scores)
    sm = jax.nn.softmax(logits_scores.astype(jnp.float32), axis=1)
    per_row = jnp.sum(jnp.where(negative_mask, sm * sig, 0.0), axis=1)
    return -jnp.mean(jnp.log(per_row + _EPS))


if __name__ == "__main__":
    key = jax.random.PRNGKey(0)
    N, M = 16, 32   # 16 positive targets, 32 candidate samples (in-batch + extra)
    k1, k2 = jax.random.split(key)
    logits = jax.random.normal(k1, (N, M), dtype=jnp.float32)

    row_ids = jnp.arange(N)[:, None]
    col_ids = jnp.arange(M)[None, :]
    diag_neg_mask = row_ids != col_ids                           # standard mask

    # A general mask (some negatives knocked out) to exercise the masked path.
    keep = jax.random.bernoulli(k2, 0.9, (N, M))
    general_mask = jnp.logical_and(diag_neg_mask, keep)

    # 1) general path: explicit negative_mask streamed as int8.
    out_general = jax.block_until_ready(bpr_max_loss(logits, general_mask))
    ref_general = _bpr_max_ref(logits, general_mask)
    assert jnp.allclose(out_general, ref_general, rtol=1e-5, atol=1e-5), (
        out_general, ref_general)

    # 2) fast path: mask derived in-kernel (no mask HBM stream).
    out_fast = jax.block_until_ready(bpr_max_loss(logits))
    ref_fast = _bpr_max_ref(logits, diag_neg_mask)
    assert jnp.allclose(out_fast, ref_fast, rtol=1e-5, atol=1e-5), (
        out_fast, ref_fast)

    assert bool(jnp.isfinite(out_general)) and bool(jnp.isfinite(out_fast))
    print("KERNEL_OK")
</pallas_src>

<mosaic_0001>
module attributes {stable_mosaic.version = 11 : i64} {
  func.func @_bpr_max_kernel(%arg0: i32, %arg1: memref<32x128xf32, #tpu.memory_space<vmem>>, %arg2: memref<32x128xi8, #tpu.memory_space<vmem>>, %arg3: memref<32x1xf32, #tpu.memory_space<vmem>>) attributes {dimension_semantics = [#tpu.dimension_semantics<parallel>], iteration_bounds = array<i64: 1>, scalar_prefetch = 0 : i64, scratch_operands = 0 : i64, tpu.core_type = #tpu.core_type<tc>, window_params = [{transform_indices = @transform_0, window_bounds = array<i64: 32, 128>}, {transform_indices = @transform_1, window_bounds = array<i64: 32, 128>}, {transform_indices = @transform_2, window_bounds = array<i64: 32, 1>}]} {
    %c0 = arith.constant 0 : index
    %c0_0 = arith.constant 0 : index
    %0 = vector.load %arg1[%c0, %c0_0] : memref<32x128xf32, #tpu.memory_space<vmem>>, vector<32x128xf32>
    %1 = tpu.iota {dimensions = array<i32: 0>} : vector<32x128xi32>
    %c32_i32 = arith.constant 32 : i32
    %2 = arith.muli %arg0, %c32_i32 : i32
    %3 = vector.broadcast %2 : i32 to vector<32x128xi32>
    %4 = arith.addi %1, %3 : vector<32x128xi32>
    %5 = tpu.iota {dimensions = array<i32: 1>} : vector<32x128xi32>
    %6 = arith.cmpi eq, %4, %5 : vector<32x128xi32>
    %7 = arith.extui %6 : vector<32x128xi1> to vector<32x128xi32>
    %8 = arith.sitofp %7 : vector<32x128xi32> to vector<32x128xf32>
    %9 = arith.mulf %0, %8 : vector<32x128xf32>
    %cst = arith.constant dense<0.000000e+00> : vector<32xf32>
    %10 = vector.multi_reduction <add>, %9, %cst [1] : vector<32x128xf32> to vector<32xf32>
    %11 = vector.shape_cast %10 : vector<32xf32> to vector<32x1xf32>
    %c0_1 = arith.constant 0 : index
    %c0_2 = arith.constant 0 : index
    %12 = vector.load %arg2[%c0_1, %c0_2] : memref<32x128xi8, #tpu.memory_space<vmem>>, vector<32x128xi8>
    %c0_i8 = arith.constant 0 : i8
    %13 = vector.broadcast %c0_i8 : i8 to vector<32x128xi8>
    %14 = arith.cmpi ne, %12, %13 : vector<32x128xi8>
    %15 = vector.broadcast %11 : vector<32x1xf32> to vector<32x128xf32>
    %16 = arith.subf %15, %0 : vector<32x128xf32>
    %17 = math.absf %16 : vector<32x128xf32>
    %cst_3 = arith.constant 0.000000e+00 : f32
    %18 = vector.broadcast %cst_3 : f32 to vector<32x128xf32>
    %19 = arith.subf %18, %17 : vector<32x128xf32>
    %20 = math.exp %19 : vector<32x128xf32>
    %cst_4 = arith.constant 1.000000e+00 : f32
    %21 = vector.broadcast %cst_4 : f32 to vector<32x128xf32>
    %22 = arith.addf %21, %20 : vector<32x128xf32>
    %cst_5 = arith.constant 1.000000e+00 : f32
    %23 = vector.broadcast %cst_5 : f32 to vector<32x128xf32>
    %24 = arith.divf %23, %22 : vector<32x128xf32>
    %cst_6 = arith.constant 0.000000e+00 : f32
    %25 = vector.broadcast %cst_6 : f32 to vector<32x128xf32>
    %26 = arith.cmpf oge, %16, %25 : vector<32x128xf32>
    %27 = arith.mulf %20, %24 : vector<32x128xf32>
    %28 = arith.select %26, %24, %27 : vector<32x128xi1>, vector<32x128xf32>
    %cst_7 = arith.constant dense<0xFF800000> : vector<32xf32>
    %29 = vector.multi_reduction <maximumf>, %0, %cst_7 [1] : vector<32x128xf32> to vector<32xf32>
    %30 = vector.shape_cast %29 : vector<32xf32> to vector<32x1xf32>
    %31 = vector.broadcast %30 : vector<32x1xf32> to vector<32x128xf32>
    %32 = arith.subf %0, %31 : vector<32x128xf32>
    %33 = math.exp %32 : vector<32x128xf32>
    %cst_8 = arith.constant dense<0.000000e+00> : vector<32xf32>
    %34 = vector.multi_reduction <add>, %33, %cst_8 [1] : vector<32x128xf32> to vector<32xf32>
    %35 = vector.shape_cast %34 : vector<32xf32> to vector<32x1xf32>
    %36 = arith.mulf %33, %28 : vector<32x128xf32>
    %cst_9 = arith.constant 0.000000e+00 : f32
    %37 = vector.broadcast %cst_9 : f32 to vector<32x128xf32>
    %38 = arith.select %14, %36, %37 : vector<32x128xi1>, vector<32x128xf32>
    %cst_10 = arith.constant dense<0.000000e+00> : vector<32xf32>
    %39 = vector.multi_reduction <add>, %38, %cst_10 [1] : vector<32x128xf32> to vector<32xf32>
    %40 = vector.shape_cast %39 : vector<32xf32> to vector<32x1xf32>
    %41 = arith.divf %40, %35 : vector<32x1xf32>
    %cst_11 = arith.constant 1.000000e-24 : f32
    %42 = vector.broadcast %cst_11 : f32 to vector<32x1xf32>
    %43 = arith.addf %41, %42 : vector<32x1xf32>
    %44 = math.log %43 : vector<32x1xf32>
    %45 = tpu.iota {dimensions = array<i32: 0>} : vector<32x1xi32>
    %c32_i32_12 = arith.constant 32 : i32
    %46 = arith.muli %arg0, %c32_i32_12 : i32
    %47 = vector.broadcast %46 : i32 to vector<32x1xi32>
    %48 = arith.addi %45, %47 : vector<32x1xi32>
    %c16_i32 = arith.constant 16 : i32
    %49 = vector.broadcast %c16_i32 : i32 to vector<32x1xi32>
    %50 = arith.cmpi slt, %48, %49 : vector<32x1xi32>
    %cst_13 = arith.constant 0.000000e+00 : f32
    %51 = vector.broadcast %cst_13 : f32 to vector<32x1xf32>
    %52 = arith.select %50, %44, %51 : vector<32x1xi1>, vector<32x1xf32>
    %c0_14 = arith.constant 0 : index
    %c0_15 = arith.constant 0 : index
    %53 = vector.load %arg3[%c0_14, %c0_15] : memref<32x1xf32, #tpu.memory_space<vmem>>, vector<32x1xf32>
    tpu.vector_store %arg3[%c0_14, %c0_15], %52 {strides = array<i32>} : memref<32x1xf32, #tpu.memory_space<vmem>>, vector<32x1xf32>,
    return
  }
  func.func @transform_0(%arg0: i32) -> (i32, i32) {
    %c0_i32 = arith.constant 0 : i32
    %c0_i32_0 = arith.constant 0 : i32
    return %arg0, %c0_i32 : i32, i32
  }
  func.func @transform_1(%arg0: i32) -> (i32, i32) {
    %c0_i32 = arith.constant 0 : i32
    %c0_i32_0 = arith.constant 0 : i32
    return %arg0, %c0_i32 : i32, i32
  }
  func.func @transform_2(%arg0: i32) -> (i32, i32) {
    %c0_i32 = arith.constant 0 : i32
    %c0_i32_0 = arith.constant 0 : i32
    return %arg0, %c0_i32 : i32, i32
  }
}

</mosaic_0001>

<bundles_post_ra>
// kernel: tpu_custom_call.1
= control target key start
LH: loop header
LB: loop body
LE: loop exit
PB: predicated region body
PF: predicated region fallthrough
CT: control target
= control target key end

     0   :  { %7 = vsyncpa [#allocation3], 0  ;;  %s350_s0 = inlined_call_operand.hbm [shape: f32[16,128], index: 0, kind: input, shape index: {}]   ;;  %s351_s1 = inlined_call_operand.hbm [shape: s8[16,128], index: 1, kind: input, shape index: {}]   ;;  %s352_s2 = inlined_call_operand.vmem [shape: f32[32,1], index: 2, kind: output, shape index: {}]  }
   0x1   :  { %8 = vsyncpa [#allocation5], 0 }
   0x2   :  { %13 = vsyncadd [#allocation3], 256  ;;  %s305_s9 = smov [#allocation2]  }
   0x3   :  { %s14_s10 = sshll.u32 %s305_s9, 4  ;;  %s15_s10 = int_to_ptr.vmem [resolvable:$true] %s14_s10 }
   0x4   :  { %s269_s11 = scalar_lea.vmem %s15_s10, 256  ;;  %s273_s12 = scalar_lea.vmem %s15_s10, 512 }
   0x5   :  { %p270_p0 = scmp.ne.s32.totalorder %s15_s10, %s269_s11  ;;  %p274_p1 = scmp.lt.s32.totalorder %s15_s10, %s15_s10 }
   0x6   :  { %p275_p2 = scmp.lt.s32.totalorder %s273_s12, %s269_s11 }
   0x8   :  { %p276_p3 = por %p275_p2, %p274_p1 }
   0xa   :  { %p277_p4 = pnand %p276_p3, %p270_p0 }
   0xc   :  { %280 = shalt.err (!%p277_p4)
}
   0xd   :  { %s306_s13 = smov 128   ;;  %s307_s14 = smov 8  }
   0xe   :  { %20 = dma.hbm_to_vmem [thread:$0]  %s350_s0, 256, %s15_s10, [#allocation3], %s306_s13, %s306_s13, %s307_s14  }
   0xf   :  { %25 = vsyncadd [#allocation5], 64  ;;  %s308_s17 = smov [#allocation4]  }
  0x10   :  { %s26_s18 = sshll.u32 %s308_s17, 4  ;;  %s27_s18 = int_to_ptr.vmem [resolvable:$true] %s26_s18 }
  0x11   :  { %s289_s19 = scalar_lea.vmem %s27_s18, 64  ;;  %s293_s20 = scalar_lea.vmem %s27_s18, 128 }
  0x12   :  { %p290_p5 = scmp.ne.s32.totalorder %s27_s18, %s289_s19  ;;  %p294_p6 = scmp.lt.s32.totalorder %s27_s18, %s27_s18 }
  0x13   :  { %p295_p7 = scmp.lt.s32.totalorder %s293_s20, %s289_s19 }
  0x15   :  { %p296_p8 = por %p295_p7, %p294_p6 }
  0x17   :  { %p297_p9 = pnand %p296_p8, %p290_p5 }
  0x19   :  { %300 = shalt.err (!%p297_p9)
}
  0x1a   :  { %s309_s21 = smov 32   ;;  %s310_s22 = smov 2  }
  0x1b   :  { %32 = dma.hbm_to_vmem [thread:$0]  %s351_s1, 64, %s27_s18, [#allocation5], %s309_s21, %s309_s21, %s310_s22  }
  0x1c   :  { %301 = dma.done.wait [#allocation3], 512  }
  0x1d   :  { %302 = vsyncadd [#allocation3], 4294966784 }
  0x1e   :  { %303 = dma.done.wait [#allocation5], 128  }
  0x1f   :  { %304 = vsyncadd [#allocation5], 4294967168  ;;  %v45_v0 = vlaneseq  ;;  %vm218_vm0 = vcmask 7168   ;;  %v311_v1 = vmov 0.0   ;;  %v41_v6 = vld [vmem:[#allocation2] sm:$0xff]  ;;  %v42_v7 = vld [vmem:[#allocation2 + $0x8] sm:$0xff] }
  0x20   :  { %221 = vst.msk [vmem:[%s352_s2 + $0x10] sm:$0xff] %vm218_vm0, %v311_v1  ;;  %222 = vst.msk [vmem:[%s352_s2 + $0x18] sm:$0xff] %vm218_vm0, %v311_v1  ;;  %134 = vmax.xlane.f32.xlu1 %v41_v6  ;;  %v82_v33 = vld [vmem:[#allocation4] sm:$0x3]  ;;  %v83_v34 = vld [vmem:[#allocation4 + $0x2] sm:$0x3] }
  0x21   :  { %v46_v2 = vshrl.u32 %v45_v0, 7  ;;  %v57_v3 = vand.u32 127, %v45_v0  ;;  %vm86_vm3 = vnez %v82_v33  ;;  %v312_v35 = vmov 0  }
  0x22   :  { %v166_v36 = vsel %vm86_vm3, 16843009, %v312_v35  ;;  %vm87_vm4 = vnez %v83_v34 }
  0x23   :  { %vm58_vm1 = vcmp.eq.s32.totalorder %v46_v2, %v57_v3  ;;  %v47_v4 = vadd.s32 8, %v46_v2  ;;  %v170_v37 = vunpack.c.0.s8 %v166_v36  ;;  %v167_v39 = vsel %vm87_vm4, 16843009, %v312_v35 }
  0x24   :  { %v229_v5 = vsel %vm58_vm1, 1.0, %v311_v1  ;;  %136 = vmax.xlane.f32.xlu1 %v42_v7  ;;  %v171_v42 = vunpack.c.0.s8 %v167_v39 }
  0x25   :  { %vm59_vm2 = vcmp.eq.s32.totalorder %v47_v4, %v57_v3  ;;  %v70_v9 = vmul.f32 %v229_v5, %v41_v6  ;;  %vm174_vm6 = vcmp.ne.s32.totalorder %v170_v37, 0 }
  0x26   :  { %v230_v8 = vsel %vm59_vm2, 1.0, %v311_v1  ;;  %vm175_vm8 = vcmp.ne.s32.totalorder %v171_v42, 0 }
  0x27   :  { %74 = vadd.xlane.f32.xlu0 %v70_v9  ;;  %v71_v10 = vmul.f32 %v230_v8, %v42_v7 }
  0x2b   :  { %76 = vadd.xlane.f32.xlu0 %v71_v10 }
  0xa9   :  { %v135_v11 = vpop.xlane.xlu1 %134 }
  0xaa   :  { %v142_v12 = vsub.f32 %v41_v6, %v135_v11 }
  0xac   :  { %v146_v15 = vmul.f32 1.442695, %v142_v12 }
  0xad   :  { %v137_v16 = vpop.xlane.xlu1 %136 }
  0xae   :  { %241 = vpow2.f32 %v146_v15  ;;  %v143_v18 = vsub.f32 %v42_v7, %v137_v16 }
  0xb0   :  { %v75_v13 = vpop.xlane.xlu0 %74  ;;  %v148_v22 = vmul.f32 1.442695, %v143_v18 }
  0xb1   :  { %v90_v14 = vsub.f32 %v75_v13, %v41_v6 }
  0xb2   :  { %243 = vpow2.f32 %v148_v22 }
  0xb3   :  { %v94_v17 = vand.u32 2147483647, %v90_v14  ;;  %vm122_vm5 = vcmp.ge.f32.partialorder %v90_v14, 0.0 }
  0xb4   :  { %v77_v19 = vpop.xlane.xlu0 %76 }
  0xb5   :  { %v98_v20 = vsub.f32 0.0, %v94_v17  ;;  %v91_v21 = vsub.f32 %v77_v19, %v42_v7 }
  0xb7   :  { %v102_v23 = vmul.f32 1.442695, %v98_v20  ;;  %v95_v24 = vand.u32 2147483647, %v91_v21  ;;  %vm123_vm7 = vcmp.ge.f32.partialorder %v91_v21, 0.0 }
  0xb9   :  { %245 = vpow2.f32 %v102_v23  ;;  %v99_v25 = vsub.f32 0.0, %v95_v24 }
  0xbb   :  { %v104_v26 = vmul.f32 1.442695, %v99_v25  ;;  %v242_v27 = vpop.eup %241 }
  0xbc   :  { %154 = vadd.xlane.f32.xlu0 %v242_v27 }
  0xbd   :  { %247 = vpow2.f32 %v104_v26 }
  0xbf   :  { %v244_v28 = vpop.eup %243 }
  0xc0   :  { %156 = vadd.xlane.f32.xlu1 %v244_v28 }
  0xc6   :  { %v246_v29 = vpop.eup %245 }
  0xc7   :  { %v110_v30 = vadd.f32 1.0, %v246_v29 }
  0xc9   :  { %249 = vrcp.f32 %v110_v30 }
  0xca   :  { %v248_v31 = vpop.eup %247 }
  0xcb   :  { %v111_v32 = vadd.f32 1.0, %v248_v31 }
  0xcd   :  { %251 = vrcp.f32 %v111_v32 }
  0xd6   :  { %v250_v38 = vpop.eup %249 }
  0xd7   :  { %v126_v40 = vmul.f32 %v250_v38, %v246_v29 }
  0xd9   :  { %v130_v41 = vsel %vm122_vm5, %v250_v38, %v126_v40 }
  0xda   :  { %v252_v43 = vpop.eup %251  ;;  %v162_v44 = vmul.f32 %v242_v27, %v130_v41 }
  0xdb   :  { %v127_v45 = vmul.f32 %v252_v43, %v248_v31 }
  0xdc   :  { %v178_v46 = vsel %vm174_vm6, %v162_v44, 0.0 }
  0xdd   :  { %182 = vadd.xlane.f32.xlu0 %v178_v46  ;;  %v131_v47 = vsel %vm123_vm7, %v252_v43, %v127_v45 }
  0xde   :  { %v163_v48 = vmul.f32 %v244_v28, %v131_v47 }
  0xe0   :  { %v179_v49 = vsel %vm175_vm8, %v163_v48, 0.0 }
  0xe1   :  { %184 = vadd.xlane.f32.xlu1 %v179_v49 }
 0x145   :  { %v155_v50 = vpop.xlane.xlu0 %154 }
 0x146   :  { %253 = vrcp.f32 %v155_v50 }
 0x149   :  { %v157_v51 = vpop.xlane.xlu1 %156 }
 0x14a   :  { %255 = vrcp.f32 %v157_v51 }
 0x153   :  { %v254_v52 = vpop.eup %253 }
 0x157   :  { %v256_v55 = vpop.eup %255 }
 0x166   :  { %v183_v53 = vpop.xlane.xlu0 %182 }
 0x167   :  { %v191_v54 = vmul.f32 %v254_v52, %v183_v53 }
 0x169   :  { %v198_v56 = vadd.f32 1e-24, %v191_v54 }
 0x16a   :  { %v185_v57 = vpop.xlane.xlu1 %184 }
 0x16b   :  { %257 = vlog2.f32 %v198_v56  ;;  %v193_v58 = vmul.f32 %v256_v55, %v185_v57 }
 0x16d   :  { %v199_v59 = vadd.f32 1e-24, %v193_v58 }
 0x16f   :  { %259 = vlog2.f32 %v199_v59 }
 0x178   :  { %v258_v60 = vpop.eup %257 }
 0x179   :  { %v203_v61 = vmul.f32 0.6931472, %v258_v60 }
 0x17b   :  { %219 = vst.msk [vmem:[%s352_s2] sm:$0xff] %vm218_vm0, %v203_v61 }
 0x17c   :  { %v260_v62 = vpop.eup %259 }
 0x17d   :  { %v205_v63 = vmul.f32 0.6931472, %v260_v62 }
 0x17f   :  { %220 = vst.msk [vmem:[%s352_s2 + $0x8] sm:$0xff] %vm218_vm0, %v205_v63 }
 0x180   :  { %227 = vsyncpa [#allocation3], 1 }
 0x181   :  { %228 = vsyncpa [#allocation5], 1 }

</bundles_post_ra>
